<compile_context>
chip_gen: v7x
topology: tpu7x:2x2x1
jax: 0.10.0
libtpu: 0.0.40
codegen_flags: <defaults>
</compile_context>

<pallas_src>
import functools

import jax
import jax.numpy as jnp
from jax.experimental import pallas as pl
from jax.experimental.pallas import tpu as pltpu

IN_FEATURES = 10
HIDDEN = 32
OUT_FEATURES = 5

# Padded ("kernel") sizes: K -> multiple of 8 sublanes, hidden/out -> lane-dense 128.
IN_PAD = 16
HID_PAD = 128
OUT_PAD = 128


def toy_model_kernel(x_ref, w1_ref, b1_ref, w2_ref, b2_ref, o_ref):
    # Two MXU matmuls + full-vreg bias add + ReLU, all in VMEM.
    x = x_ref[...]                                           # (Bt, IN_PAD) f32
    h = jnp.dot(x, w1_ref[...],
                preferred_element_type=jnp.float32)          # (Bt, HID_PAD)
    h = jnp.maximum(h + b1_ref[...], 0.0)                    # ReLU (padded cols stay 0)
    y = jnp.dot(h, w2_ref[...],
                preferred_element_type=jnp.float32)          # (Bt, OUT_PAD)
    o_ref[...] = (y + b2_ref[...]).astype(o_ref.dtype)


def toy_model_forward(x, w1p, b1p, w2p, b2p, *, block_b=1024):
    """x: (B, 10) f32, padded params -> (B, 5) f32."""
    B = x.shape[0]
    # Zero-pad the contraction dim once in the wrapper (cheap; keeps the kernel
    # operating on aligned, lane/sublane-friendly shapes).
    x_p = jnp.pad(x, ((0, 0), (0, IN_PAD - x.shape[1])))

    vmem = pltpu.MemorySpace.VMEM

    if B <= block_b:
        # Small batch: no grid, no pipelining — whole arrays live in VMEM.
        out_p = pl.pallas_call(
            toy_model_kernel,
            out_shape=jax.ShapeDtypeStruct((B, OUT_PAD), jnp.float32),
            in_specs=[pl.BlockSpec(memory_space=vmem)] * 5,
            out_specs=pl.BlockSpec(memory_space=vmem),
        )(x_p, w1p, b1p, w2p, b2p)
    else:
        # Large batch: tile over batch rows; weights/biases stay VMEM-resident
        # (index_map always returns block (0, 0)). Batch tiles are independent
        # -> "parallel" (shards across TensorCores on megacore parts).
        num_blocks = pl.cdiv(B, block_b)
        Bp = num_blocks * block_b
        if Bp != B:
            x_p = jnp.pad(x_p, ((0, Bp - B), (0, 0)))
        out_p = pl.pallas_call(
            toy_model_kernel,
            out_shape=jax.ShapeDtypeStruct((Bp, OUT_PAD), jnp.float32),
            grid=(num_blocks,),
            in_specs=[
                pl.BlockSpec((block_b, IN_PAD), lambda i: (i, 0)),
                pl.BlockSpec((IN_PAD, HID_PAD), lambda i: (0, 0)),
                pl.BlockSpec((1, HID_PAD), lambda i: (0, 0)),
                pl.BlockSpec((HID_PAD, OUT_PAD), lambda i: (0, 0)),
                pl.BlockSpec((1, OUT_PAD), lambda i: (0, 0)),
            ],
            out_specs=pl.BlockSpec((block_b, OUT_PAD), lambda i: (i, 0)),
            compiler_params=pltpu.CompilerParams(
                dimension_semantics=("parallel",),
                vmem_limit_bytes=32 * 1024 * 1024,
            ),
        )(x_p, w1p, b1p, w2p, b2p)
        out_p = out_p[:B]

    # Slice back to the true out_features.
    return out_p[:, :OUT_FEATURES]
    # TODO(synk): for very large B on v6e/v7x, cast x/w to bf16 before the dots
    # (keep f32 accumulate) to halve HBM traffic; kept f32 here for exactness.


def init_params(key):
    """Deterministic init matching nn.Linear shapes (PyTorch default uniform).

    Returns the *unpadded* parameters (stored transposed as (in, out))."""
    k1, k2, k3, k4 = jax.random.split(key, 4)
    lim1 = 1.0 / jnp.sqrt(jnp.float32(IN_FEATURES))
    lim2 = 1.0 / jnp.sqrt(jnp.float32(HIDDEN))
    w1 = jax.random.uniform(k1, (IN_FEATURES, HIDDEN), jnp.float32, -lim1, lim1)
    b1 = jax.random.uniform(k2, (1, HIDDEN), jnp.float32, -lim1, lim1)
    w2 = jax.random.uniform(k3, (HIDDEN, OUT_FEATURES), jnp.float32, -lim2, lim2)
    b2 = jax.random.uniform(k4, (1, OUT_FEATURES), jnp.float32, -lim2, lim2)
    return w1, b1, w2, b2


def pad_params(w1, b1, w2, b2):
    """Zero-pad params once (init-time) to tile/lane-friendly kernel shapes."""
    w1p = jnp.zeros((IN_PAD, HID_PAD), jnp.float32).at[:IN_FEATURES, :HIDDEN].set(w1)
    b1p = jnp.zeros((1, HID_PAD), jnp.float32).at[:, :HIDDEN].set(b1)
    w2p = jnp.zeros((HID_PAD, OUT_PAD), jnp.float32).at[:HIDDEN, :OUT_FEATURES].set(w2)
    b2p = jnp.zeros((1, OUT_PAD), jnp.float32).at[:, :OUT_FEATURES].set(b2)
    return w1p, b1p, w2p, b2p


if __name__ == "__main__":
    key = jax.random.PRNGKey(0)
    k_params, k_x = jax.random.split(key)

    batch = 8
    x = jax.random.normal(k_x, (batch, IN_FEATURES), jnp.float32)
    w1, b1, w2, b2 = init_params(k_params)
    w1p, b1p, w2p, b2p = pad_params(w1, b1, w2, b2)

    fwd = jax.jit(functools.partial(toy_model_forward, block_b=1024))
    out = fwd(x, w1p, b1p, w2p, b2p)
    jax.block_until_ready(out)

    # Pure-JAX reference with the unpadded params.
    ref = jnp.maximum(x @ w1 + b1, 0.0) @ w2 + b2
    assert out.shape == (batch, OUT_FEATURES)
    assert jnp.allclose(out, ref, atol=1e-5, rtol=1e-5)

    print("KERNEL_OK")
</pallas_src>

<mosaic_0001>
module attributes {stable_mosaic.version = 11 : i64} {
  func.func @toy_model_kernel(%arg0: memref<8x16xf32, #tpu.memory_space<vmem>>, %arg1: memref<16x128xf32, #tpu.memory_space<vmem>>, %arg2: memref<1x128xf32, #tpu.memory_space<vmem>>, %arg3: memref<128x128xf32, #tpu.memory_space<vmem>>, %arg4: memref<1x128xf32, #tpu.memory_space<vmem>>, %arg5: memref<8x128xf32, #tpu.memory_space<vmem>>) attributes {dimension_semantics = [], scalar_prefetch = 0 : i64, scratch_operands = 0 : i64, tpu.core_type = #tpu.core_type<tc>} {
    %c0 = arith.constant 0 : index
    %c0_0 = arith.constant 0 : index
    %0 = vector.load %arg0[%c0, %c0_0] : memref<8x16xf32, #tpu.memory_space<vmem>>, vector<8x16xf32>
    %c0_1 = arith.constant 0 : index
    %c0_2 = arith.constant 0 : index
    %1 = vector.load %arg1[%c0_1, %c0_2] : memref<16x128xf32, #tpu.memory_space<vmem>>, vector<16x128xf32>
    %cst = arith.constant dense<0.000000e+00> : vector<8x128xf32>
    %2 = tpu.matmul %0, %1, %cst {dimension_numbers = #tpu.dot_dimension_numbers<[1], [0], [0], [1], [0, 0, 1, 1], [], []>} : vector<8x16xf32>, vector<16x128xf32>, vector<8x128xf32> -> vector<8x128xf32>
    %c0_3 = arith.constant 0 : index
    %c0_4 = arith.constant 0 : index
    %3 = vector.load %arg2[%c0_3, %c0_4] : memref<1x128xf32, #tpu.memory_space<vmem>>, vector<1x128xf32>
    %4 = vector.broadcast %3 : vector<1x128xf32> to vector<8x128xf32>
    %5 = arith.addf %2, %4 : vector<8x128xf32>
    %cst_5 = arith.constant 0.000000e+00 : f32
    %6 = vector.broadcast %cst_5 : f32 to vector<8x128xf32>
    %7 = arith.maximumf %5, %6 : vector<8x128xf32>
    %c0_6 = arith.constant 0 : index
    %c0_7 = arith.constant 0 : index
    %8 = vector.load %arg3[%c0_6, %c0_7] : memref<128x128xf32, #tpu.memory_space<vmem>>, vector<128x128xf32>
    %cst_8 = arith.constant dense<0.000000e+00> : vector<8x128xf32>
    %9 = tpu.matmul %7, %8, %cst_8 {dimension_numbers = #tpu.dot_dimension_numbers<[1], [0], [0], [1], [0, 0, 1, 1], [], []>} : vector<8x128xf32>, vector<128x128xf32>, vector<8x128xf32> -> vector<8x128xf32>
    %c0_9 = arith.constant 0 : index
    %c0_10 = arith.constant 0 : index
    %10 = vector.load %arg4[%c0_9, %c0_10] : memref<1x128xf32, #tpu.memory_space<vmem>>, vector<1x128xf32>
    %11 = vector.broadcast %10 : vector<1x128xf32> to vector<8x128xf32>
    %12 = arith.addf %9, %11 : vector<8x128xf32>
    %c0_11 = arith.constant 0 : index
    %c0_12 = arith.constant 0 : index
    %13 = vector.load %arg5[%c0_11, %c0_12] : memref<8x128xf32, #tpu.memory_space<vmem>>, vector<8x128xf32>
    tpu.vector_store %arg5[%c0_11, %c0_12], %12 {strides = array<i32>} : memref<8x128xf32, #tpu.memory_space<vmem>>, vector<8x128xf32>,
    return
  }
}

</mosaic_0001>

<bundles_post_ra>
// kernel: toy_model_forward.1
= control target key start
LH: loop header
LB: loop body
LE: loop exit
PB: predicated region body
PF: predicated region fallthrough
CT: control target
= control target key end

     0   :  { %10 = vsyncpa [#allocation3], 0  ;;  %s452_s0 = inlined_call_operand.vmem [shape: f32[8,16], index: 0, kind: input, shape index: {}]   ;;  %s453_s1 = inlined_call_operand.vmem [shape: f32[16,128], index: 1, kind: input, shape index: {}]   ;;  %s454_s2 = inlined_call_operand.vmem [shape: f32[1,128], index: 2, kind: input, shape index: {}]   ;;  %s455_s3 = inlined_call_operand.hbm [shape: f32[128,128], index: 3, kind: input, shape index: {}]   ;;  %s456_s4 = inlined_call_operand.vmem [shape: f32[1,128], index: 4, kind: input, shape index: {}]   ;;  %s457_s5 = inlined_call_operand.hbm [shape: f32[8,128], index: 5, kind: output, shape index: {}]  }
   0x1   :  { %11 = vsyncpa [#allocation4], 0  ;;  %s376_s18 = smov [#allocation2]   ;;  %s328_s22 = scalar_lea.hbm %s455_s3, 2048 }
   0x2   :  { %s23_s19 = sshll.u32 %s376_s18, 4  ;;  %p329_p0 = scmp.ne.s32.totalorder %s455_s3, %s328_s22  ;;  %s24_s19 = int_to_ptr.vmem [resolvable:$true] %s23_s19 }
   0x3   :  { %p332_p1 = scmp.lt.u32.totalorder %s328_s22, %s455_s3 }
   0x5   :  { %p334_p2 = pnand %p332_p1, %p329_p0 }
   0x7   :  { %337 = shalt.err (!%p334_p2)
}
   0x8   :  { %s338_s27 = scalar_lea.vmem %s24_s19, 2048  ;;  %p343_p4 = scmp.lt.s32.totalorder %s24_s19, %s24_s19 }
   0x9   :  { %p339_p3 = scmp.ne.s32.totalorder %s24_s19, %s338_s27  ;;  %p344_p5 = scmp.lt.s32.totalorder %s338_s27, %s338_s27 }
   0xb   :  { %p345_p6 = por %p344_p5, %p343_p4 }
   0xd   :  { %p346_p7 = pnand %p345_p6, %p339_p3 }
   0xf   :  { %349 = shalt.err (!%p346_p7)
}
  0x10   :  { %s377_s28 = smov 128   ;;  %s378_s29 = smov 8  }
  0x11   :  { %29 = dma.hbm_to_vmem [thread:$0]  %s455_s3, 2048, %s24_s19, [#allocation3], %s377_s28, %s377_s28, %s378_s29  }
  0x12   :  { %372 = dma.done.wait [#allocation3], 2048  }
  0x13   :  { %373 = vsyncadd [#allocation3], 4294965248  ;;  %v379_v0 = vmov 0.0|0.0   ;;  %vm380_vm0 = vmmov 0   ;;  %v381_v1 = vmov 0.0   ;;  %v36_v2 = vld [vmem:[%s453_s1] sm:$0xff] }
  0x14   :  { %294 = vmatprep.subr.bf16.mxu0 %v379_v0  ;;  %256 = vmatprep.mubr.msk.f32.mxu0 %vm380_vm0, %v381_v1  ;;  %v37_v3 = vld [vmem:[%s453_s1 + $0x8] sm:$0xff]  ;;  %v120_v5 = vld [vmem:[#allocation2] sm:$0xff]  ;;  %v121_v6 = vld [vmem:[#allocation2 + $0x8] sm:$0xff]  ;;  %vm45_vm1 = vcmask 130048   ;;  %s382_s14 = smov [#allocation5]  }
  0x15   :  { %297 = vmatprep.subr.bf16.mxu1 %v379_v0  ;;  %291 = vmatprep.mubr.msk.f32.mxu1 %vm380_vm0, %v381_v1  ;;  %v295_v4 = vpack.c.bf16 %v37_v3, %v36_v2  ;;  %v122_v7 = vld [vmem:[#allocation2 + $0x10] sm:$0xff]  ;;  %v298_v8 = vpack.c.bf16 %v121_v6, %v120_v5  ;;  %v123_v9 = vld [vmem:[#allocation2 + $0x18] sm:$0xff]  ;;  %v35_v10 = vld [vmem:[%s452_s0] sm:$0xff]  ;;  %s220_s15 = sshll.u32 %s382_s14, 4  ;;  %s221_s15 = int_to_ptr.vmem [resolvable:$true] %s220_s15 }
  0x16   :  { %v301_v11 = vpack.c.bf16 %v123_v9, %v122_v7  ;;  %v124_v12 = vld [vmem:[#allocation2 + $0x20] sm:$0xff]  ;;  %v125_v13 = vld [vmem:[#allocation2 + $0x28] sm:$0xff]  ;;  %v126_v15 = vld [vmem:[#allocation2 + $0x30] sm:$0xff]  ;;  %s350_s16 = scalar_lea.vmem %s221_s15, 128  ;;  %p355_p9 = scmp.lt.s32.totalorder %s221_s15, %s221_s15 }
  0x17   :  { %296 = vmatpush3.bf16.msra.mxu0 %v295_v4  ;;  %299 = vmatpush3.bf16.msra.mxu1 %v298_v8  ;;  %v304_v14 = vpack.c.bf16 %v125_v13, %v124_v12  ;;  %v127_v16 = vld [vmem:[#allocation2 + $0x38] sm:$0xff]  ;;  %v128_v18 = vld [vmem:[#allocation2 + $0x40] sm:$0xff]  ;;  %v129_v19 = vld [vmem:[#allocation2 + $0x48] sm:$0xff]  ;;  %p351_p8 = scmp.ne.s32.totalorder %s221_s15, %s350_s16  ;;  %p356_p10 = scmp.lt.s32.totalorder %s350_s16, %s350_s16 }
  0x18   :  { %300 = vmatprep.subr.bf16.mxu1 %v379_v0  ;;  %v307_v17 = vpack.c.bf16 %v127_v16, %v126_v15  ;;  %v310_v20 = vpack.c.bf16 %v129_v19, %v128_v18  ;;  %v130_v21 = vld [vmem:[#allocation2 + $0x50] sm:$0xff]  ;;  %v131_v22 = vld [vmem:[#allocation2 + $0x58] sm:$0xff]  ;;  %v132_v24 = vld [vmem:[#allocation2 + $0x60] sm:$0xff] }
  0x19   :  { %v313_v23 = vpack.c.bf16 %v131_v22, %v130_v21  ;;  %v133_v25 = vld [vmem:[#allocation2 + $0x68] sm:$0xff]  ;;  %v134_v27 = vld [vmem:[#allocation2 + $0x70] sm:$0xff]  ;;  %v135_v28 = vld [vmem:[#allocation2 + $0x78] sm:$0xff]  ;;  %p357_p11 = por %p356_p10, %p355_p9 }
  0x1a   :  { %257 = vmatmul.mubr.msk.f32.vlgmr.msra.gmra.mrb[0].mxu0 %vm45_vm1, %v35_v10  ;;  %v316_v26 = vpack.c.bf16 %v133_v25, %v132_v24  ;;  %v319_v29 = vpack.c.bf16 %v135_v28, %v134_v27  ;;  %v229_v30 = vld [vmem:[%s454_s2] ss:$0 sm:$0xff] }
  0x1b   :  { %302 = vmatpush3.bf16.msra.mxu1 %v301_v11  ;;  %v231_v35 = vld [vmem:[%s456_s4] ss:$0 sm:$0xff]  ;;  %p358_p12 = pnand %p357_p11, %p351_p8 }
  0x1c   :  { %303 = vmatprep.subr.bf16.mxu1 %v379_v0 }
  0x1f   :  { %305 = vmatpush3.bf16.msra.mxu1 %v304_v14 }
  0x20   :  { %306 = vmatprep.subr.bf16.mxu1 %v379_v0 }
  0x23   :  { %308 = vmatpush3.bf16.msra.mxu1 %v307_v17 }
  0x24   :  { %309 = vmatprep.subr.bf16.mxu1 %v379_v0 }
  0x27   :  { %311 = vmatpush3.bf16.msra.mxu1 %v310_v20 }
  0x28   :  { %312 = vmatprep.subr.bf16.mxu1 %v379_v0 }
  0x2b   :  { %314 = vmatpush3.bf16.msra.mxu1 %v313_v23 }
  0x2c   :  { %315 = vmatprep.subr.bf16.mxu1 %v379_v0 }
  0x2f   :  { %317 = vmatpush3.bf16.msra.mxu1 %v316_v26 }
  0x30   :  { %318 = vmatprep.subr.bf16.mxu1 %v379_v0 }
  0x33   :  { %320 = vmatpush3.bf16.msra.mxu1 %v319_v29 }
  0xed   :  { %v115_v31 = vpop.f32.mrb[0].mxu0 }
  0xee   :  { %v116_v32 = vadd.f32 %v229_v30, %v115_v31  ;;  %v258_v33 = vpop.f32.mrb[1].mxu0 }
  0xf0   :  { %v119_v34 = vmax.f32 %v116_v32, 0.0 }
  0xf2   :  { %292 = vmatmul.mubr.f32.vlgmr.msra.gmra.mrb[0].mxu1 %v119_v34 }
 0x1c5   :  { %v209_v36 = vpop.f32.mrb[0].mxu1 }
 0x1c6   :  { %v210_v37 = vadd.f32 %v231_v35, %v209_v36  ;;  %v293_v38 = vpop.f32.mrb[1].mxu1 }
 0x1c8   :  { %213 = vst [vmem:[#allocation5] sm:$0xff] %v210_v37 }
 0x1c9   :  { %361 = shalt.err (!%p358_p12)
}
 0x1ca   :  { %s362_s18 = scalar_lea.hbm %s457_s5, 128 }
 0x1cb   :  { %p363_p13 = scmp.ne.s32.totalorder %s457_s5, %s362_s18  ;;  %p366_p0 = scmp.lt.u32.totalorder %s362_s18, %s457_s5 }
 0x1cd   :  { %p368_p1 = pnand %p366_p0, %p363_p13 }
 0x1cf   :  { %371 = shalt.err (!%p368_p1)
}
 0x1d0   :  { %223 = dma.vmem_to_hbm [thread:$0]  %s221_s15, 128, %s457_s5, [#allocation4]  }
 0x1d1   :  { %374 = dma.done.wait [#allocation4], 128  }
 0x1d2   :  { %375 = vsyncadd [#allocation4], 4294967168 }
 0x1d3   :  { %227 = vsyncpa [#allocation3], 1 }
 0x1d4   :  { %228 = vsyncpa [#allocation4], 1 }

</bundles_post_ra>
